<compile_context>
chip_gen: v7x
topology: tpu7x:2x2x1
jax: 0.10.0
libtpu: 0.0.40
codegen_flags: <defaults>
</compile_context>

<pallas_src>
import jax
import jax.numpy as jnp
from jax.experimental import pallas as pl
from jax.experimental.pallas import tpu as pltpu


def _round_up(a, b):
    return (a + b - 1) // b * b


def _pos_processor_kernel(counts_ref, xT_ref, ea_ref, j_ref,
                          w1xT_ref, w1aT_ref, b1_ref, w2T_ref, b2_ref,
                          gamma_ref, beta_ref,
                          oT_ref, agg_ref):
    n_idx = pl.program_id(0)
    e_idx = pl.program_id(1)

    De = agg_ref.shape[0]
    TN = agg_ref.shape[1]
    TE = ea_ref.shape[1]

    @pl.when(e_idx == 0)
    def _init():
        agg_ref[...] = jnp.zeros_like(agg_ref)

    # Skip edge tiles that contribute nothing to this node tile (occupancy table).
    @pl.when(counts_ref[n_idx, e_idx] > 0)
    def _scatter():
        # one-hot [TN, TE]: sublane n is 1 on the lanes of edges whose destination
        # is node (n_base + n).  Padded edges carry j = -1 and never match.
        n_base = n_idx * TN
        node_ids = jax.lax.broadcasted_iota(jnp.int32, (TN, TE), 0) + n_base
        onehot_nt = (node_ids == j_ref[...]).astype(jnp.bfloat16)     # [TN, TE]

        # agg^T += ea^T @ onehot^T  via a single transposed-RHS matmul that shares
        # the one-hot weight push between the bf16 hi and lo halves of edge_attr.
        contrib = jax.lax.dot_general(
            ea_ref[...], onehot_nt,
            dimension_numbers=(((1,), (1,)), ((), ())),
            preferred_element_type=jnp.float32)                        # [2*De, TN]
        agg_ref[...] += contrib[:De, :] + contrib[De:, :]

    @pl.when(e_idx == pl.num_programs(1) - 1)
    def _finalize():
        xT = xT_ref[...]                                               # [Dx, TN] f32

        # Linear(Dx + De -> H) + SiLU, with the concat expressed as two matmuls.
        hT = (jnp.dot(w1xT_ref[...], xT, preferred_element_type=jnp.float32)
              + jnp.dot(w1aT_ref[...], agg_ref[...],
                        preferred_element_type=jnp.float32)
              + b1_ref[...])
        hT = hT * jax.nn.sigmoid(hT)

        # Linear(H -> Dx)
        yT = jnp.dot(w2T_ref[...], hT,
                     preferred_element_type=jnp.float32) + b2_ref[...]

        # LayerNorm over the feature axis (sublanes), eps = 1e-5, biased variance.
        mean = jnp.mean(yT, axis=0, keepdims=True)                     # [1, TN]
        var = jnp.mean((yT - mean) ** 2, axis=0, keepdims=True)
        y_ln = ((yT - mean) * jax.lax.rsqrt(var + 1e-5) * gamma_ref[...]
                + beta_ref[...])

        # residual
        oT_ref[...] = y_ln + xT


def pos_processor(x, edge_index, edge_attr, params, *, tn=512, te=1024):
    """x: [N, Dx] f32, edge_index: [2, E] i32, edge_attr: [E, De] f32."""
    N, Dx = x.shape
    E, De = edge_attr.shape
    H = params["b1"].shape[-1]

    # Feature dims ride the sublane axis of the transposed layout.
    assert Dx % 8 == 0 and De % 8 == 0 and H % 8 == 0, (
        "Dx, De, H must be multiples of 8 (sublane-aligned transposed layout)")

    # Tile sizes: lane axis (nodes / edges) must be a multiple of 128.
    TN = min(_round_up(tn, 128), _round_up(max(N, 1), 128))
    TE = min(_round_up(te, 128), _round_up(max(E, 1), 128))
    N_pad = _round_up(N, TN)
    E_pad = _round_up(E, TE)
    n_tiles = N_pad // TN
    e_tiles = E_pad // TE

    # Transposed + padded operands (nodes / edges on the lane axis).
    xT = jnp.zeros((Dx, N_pad), jnp.float32).at[:, :N].set(x.astype(jnp.float32).T)
    eaT = jnp.zeros((De, E_pad), jnp.float32).at[:, :E].set(
        edge_attr.astype(jnp.float32).T)
    # bf16 hi/lo split packed into ONE array on the sublane axis: [2*De, E_pad].
    ea_hi = eaT.astype(jnp.bfloat16)
    ea_lo = (eaT - ea_hi.astype(jnp.float32)).astype(jnp.bfloat16)
    ea_hl = jnp.concatenate([ea_hi, ea_lo], axis=0)

    # Destination indices lane-dense as a (1, E_pad) row; padded edges get -1.
    dst = edge_index[1].astype(jnp.int32)
    j_row = jnp.full((1, E_pad), -1, jnp.int32).at[0, :E].set(dst)

    # Per-(node-tile, edge-tile) occupancy counts for the scalar-prefetch skip.
    counts = jnp.zeros((n_tiles, e_tiles), jnp.int32).at[
        dst // TN, jnp.arange(E, dtype=jnp.int32) // TE].add(1)

    # Transposed weights (kept resident across the whole grid).
    w1xT = params["w1x"].T.astype(jnp.float32)          # [H, Dx]
    w1aT = params["w1a"].T.astype(jnp.float32)          # [H, De]
    b1 = params["b1"].reshape(H, 1).astype(jnp.float32)
    w2T = params["w2"].T.astype(jnp.float32)            # [Dx, H]
    b2 = params["b2"].reshape(Dx, 1).astype(jnp.float32)
    gamma = params["gamma"].reshape(Dx, 1).astype(jnp.float32)
    beta = params["beta"].reshape(Dx, 1).astype(jnp.float32)

    grid = (n_tiles, e_tiles)
    resident = lambda shape: pl.BlockSpec(shape, lambda n, e, counts: (0, 0))

    oT = pl.pallas_call(
        _pos_processor_kernel,
        out_shape=jax.ShapeDtypeStruct((Dx, N_pad), jnp.float32),
        grid_spec=pltpu.PrefetchScalarGridSpec(
            num_scalar_prefetch=1,
            grid=grid,
            in_specs=[
                pl.BlockSpec((Dx, TN), lambda n, e, counts: (0, n)),      # x^T
                pl.BlockSpec((2 * De, TE), lambda n, e, counts: (0, e)),  # ea^T hi|lo
                pl.BlockSpec((1, TE), lambda n, e, counts: (0, e)),       # dest idx row
                resident((H, Dx)),                                        # W1x^T
                resident((H, De)),                                        # W1a^T
                resident((H, 1)),                                         # b1
                resident((Dx, H)),                                        # W2^T
                resident((Dx, 1)),                                        # b2
                resident((Dx, 1)),                                        # gamma
                resident((Dx, 1)),                                        # beta
            ],
            out_specs=pl.BlockSpec((Dx, TN), lambda n, e, counts: (0, n)),
            scratch_shapes=[pltpu.VMEM((De, TN), jnp.float32)],           # agg^T acc
        ),
        compiler_params=pltpu.CompilerParams(
            dimension_semantics=("parallel", "arbitrary"),
            # Small per-step footprint (~2-3 MiB); 32 MiB is safe on v5e/v6e/v7x.
            vmem_limit_bytes=32 * 1024 * 1024,
        ),
    )(counts, xT, ea_hl, j_row, w1xT, w1aT, b1, w2T, b2, gamma, beta)

    return oT[:, :N].T


def pos_processor_ref(x, edge_index, edge_attr, params):
    """Pure-JAX reference matching the PyTorch forward."""
    N = x.shape[0]
    j = edge_index[1]
    agg = jnp.zeros((N, edge_attr.shape[1]), jnp.float32).at[j].add(edge_attr)
    cat = jnp.concatenate([x, agg], axis=-1)
    w1 = jnp.concatenate([params["w1x"], params["w1a"]], axis=0)
    h = cat @ w1 + params["b1"]
    h = h * jax.nn.sigmoid(h)
    y = h @ params["w2"] + params["b2"]
    mean = jnp.mean(y, axis=-1, keepdims=True)
    var = jnp.mean((y - mean) ** 2, axis=-1, keepdims=True)
    y = (y - mean) * jax.lax.rsqrt(var + 1e-5) * params["gamma"] + params["beta"]
    return y + x


if __name__ == "__main__":
    # Small shapes consistent with the module:
    #   hidden_size_list = [Dx + De, H, Dx] = [32, 32, 16]
    N, E = 8, 16          # nodes, edges
    Dx, De, H = 16, 16, 32

    key = jax.random.PRNGKey(0)
    kx, ke, kj, k1, k2, kb1, kb2 = jax.random.split(key, 7)

    x = jax.random.normal(kx, (N, Dx), jnp.float32)
    edge_attr = jax.random.normal(ke, (E, De), jnp.float32)
    src = jax.random.randint(kj, (E,), 0, N, jnp.int32)
    dst = jax.random.randint(jax.random.fold_in(kj, 1), (E,), 0, N, jnp.int32)
    edge_index = jnp.stack([src, dst], axis=0)        # [2, E]

    D_in = Dx + De
    w1 = jax.random.normal(k1, (D_in, H), jnp.float32) * (1.0 / jnp.sqrt(D_in))
    params = {
        "w1x": w1[:Dx],
        "w1a": w1[Dx:],
        "b1": jax.random.normal(kb1, (1, H), jnp.float32) * 0.01,
        "w2": jax.random.normal(k2, (H, Dx), jnp.float32) * (1.0 / jnp.sqrt(H)),
        "b2": jax.random.normal(kb2, (1, Dx), jnp.float32) * 0.01,
        "gamma": jnp.ones((1, Dx), jnp.float32),
        "beta": jnp.zeros((1, Dx), jnp.float32),
    }

    out = pos_processor(x, edge_index, edge_attr, params)
    out = jax.block_until_ready(out)

    ref = pos_processor_ref(x, edge_index, edge_attr, params)
    assert out.shape == (N, Dx)
    max_err = float(jnp.abs(out - ref).max())
    assert jnp.allclose(out, ref, atol=1e-3, rtol=1e-3), max_err

    print("KERNEL_OK")
</pallas_src>

<mosaic_0001>
module attributes {stable_mosaic.version = 11 : i64} {
  func.func @_pos_processor_kernel(%arg0: i32, %arg1: i32, %arg2: memref<1x1xi32, #tpu.memory_space<smem>>, %arg3: memref<16x128xf32, #tpu.memory_space<vmem>>, %arg4: memref<32x128xbf16, #tpu.memory_space<vmem>>, %arg5: memref<1x128xi32, #tpu.memory_space<vmem>>, %arg6: memref<32x16xf32, #tpu.memory_space<vmem>>, %arg7: memref<32x16xf32, #tpu.memory_space<vmem>>, %arg8: memref<32x1xf32, #tpu.memory_space<vmem>>, %arg9: memref<16x32xf32, #tpu.memory_space<vmem>>, %arg10: memref<16x1xf32, #tpu.memory_space<vmem>>, %arg11: memref<16x1xf32, #tpu.memory_space<vmem>>, %arg12: memref<16x1xf32, #tpu.memory_space<vmem>>, %arg13: memref<16x128xf32, #tpu.memory_space<vmem>>, %arg14: memref<16x128xf32, #tpu.memory_space<vmem>>) attributes {dimension_semantics = [#tpu.dimension_semantics<parallel>, #tpu.dimension_semantics<arbitrary>], iteration_bounds = array<i64: 1, 1>, scalar_prefetch = 1 : i64, scratch_operands = 1 : i64, tpu.core_type = #tpu.core_type<tc>, window_params = [{transform_indices = @transform_0, window_bounds = array<i64: 16, 128>}, {transform_indices = @transform_1, window_bounds = array<i64: 32, 128>}, {transform_indices = @transform_2, window_bounds = array<i64: 1, 128>}, {pipeline_mode = #tpu.pipeline_mode<synchronous>, transform_indices = @transform_3, window_bounds = array<i64: 32, 16>}, {pipeline_mode = #tpu.pipeline_mode<synchronous>, transform_indices = @transform_4, window_bounds = array<i64: 32, 16>}, {pipeline_mode = #tpu.pipeline_mode<synchronous>, transform_indices = @transform_5, window_bounds = array<i64: 32, 1>}, {pipeline_mode = #tpu.pipeline_mode<synchronous>, transform_indices = @transform_6, window_bounds = array<i64: 16, 32>}, {pipeline_mode = #tpu.pipeline_mode<synchronous>, transform_indices = @transform_7, window_bounds = array<i64: 16, 1>}, {pipeline_mode = #tpu.pipeline_mode<synchronous>, transform_indices = @transform_8, window_bounds = array<i64: 16, 1>}, {pipeline_mode = #tpu.pipeline_mode<synchronous>, transform_indices = @transform_9, window_bounds = array<i64: 16, 1>}, {transform_indices = @transform_10, window_bounds = array<i64: 16, 128>}]} {
    %c0_i32 = arith.constant 0 : i32
    %0 = arith.cmpi eq, %arg1, %c0_i32 : i32
    %1 = arith.extui %0 : i1 to i32
    %c0_i32_0 = arith.constant 0 : i32
    %2 = arith.cmpi ne, %1, %c0_i32_0 : i32
    scf.if %2 {
      %cst = arith.constant 0.000000e+00 : f32
      %12 = vector.broadcast %cst : f32 to vector<16x128xf32>
      %c0 = arith.constant 0 : index
      %c0_5 = arith.constant 0 : index
      %13 = vector.load %arg14[%c0, %c0_5] : memref<16x128xf32, #tpu.memory_space<vmem>>, vector<16x128xf32>
      tpu.vector_store %arg14[%c0, %c0_5], %12 {strides = array<i32>} : memref<16x128xf32, #tpu.memory_space<vmem>>, vector<16x128xf32>,
    } else {
    }
    %3 = arith.index_cast %arg0 : i32 to index
    %4 = arith.index_cast %arg1 : i32 to index
    %5 = memref.load %arg2[%3, %4] : memref<1x1xi32, #tpu.memory_space<smem>>
    %c0_i32_1 = arith.constant 0 : i32
    %6 = arith.cmpi sgt, %5, %c0_i32_1 : i32
    %7 = arith.extui %6 : i1 to i32
    %c0_i32_2 = arith.constant 0 : i32
    %8 = arith.cmpi ne, %7, %c0_i32_2 : i32
    scf.if %8 {
      %c128_i32 = arith.constant 128 : i32
      %12 = arith.muli %arg0, %c128_i32 : i32
      %13 = tpu.iota {dimensions = array<i32: 0>} : vector<128x128xi32>
      %14 = vector.broadcast %12 : i32 to vector<128x128xi32>
      %15 = arith.addi %13, %14 : vector<128x128xi32>
      %c0 = arith.constant 0 : index
      %c0_5 = arith.constant 0 : index
      %16 = vector.load %arg5[%c0, %c0_5] : memref<1x128xi32, #tpu.memory_space<vmem>>, vector<1x128xi32>
      %17 = vector.broadcast %16 : vector<1x128xi32> to vector<128x128xi32>
      %18 = arith.cmpi eq, %15, %17 : vector<128x128xi32>
      %19 = arith.extui %18 : vector<128x128xi1> to vector<128x128xi32>
      %20 = arith.sitofp %19 : vector<128x128xi32> to vector<128x128xf32>
      %21 = arith.truncf %20 : vector<128x128xf32> to vector<128x128xbf16>
      %c0_6 = arith.constant 0 : index
      %c0_7 = arith.constant 0 : index
      %22 = vector.load %arg4[%c0_6, %c0_7] : memref<32x128xbf16, #tpu.memory_space<vmem>>, vector<32x128xbf16>
      %cst = arith.constant dense<0.000000e+00> : vector<32x128xf32>
      %23 = tpu.matmul %22, %21, %cst {dimension_numbers = #tpu.dot_dimension_numbers<[1], [1], [0], [0], [0, 0, 1, 0], [], []>} : vector<32x128xbf16>, vector<128x128xbf16>, vector<32x128xf32> -> vector<32x128xf32>
      %c0_8 = arith.constant 0 : index
      %c0_9 = arith.constant 0 : index
      %24 = vector.load %arg14[%c0_8, %c0_9] : memref<16x128xf32, #tpu.memory_space<vmem>>, vector<16x128xf32>
      %25 = vector.extract_strided_slice %23 {offsets = [0, 0], sizes = [16, 128], strides = [1, 1]} : vector<32x128xf32> to vector<16x128xf32>
      %26 = vector.extract_strided_slice %23 {offsets = [16, 0], sizes = [16, 128], strides = [1, 1]} : vector<32x128xf32> to vector<16x128xf32>
      %27 = arith.addf %25, %26 : vector<16x128xf32>
      %28 = arith.addf %24, %27 : vector<16x128xf32>
      %c0_10 = arith.constant 0 : index
      %c0_11 = arith.constant 0 : index
      %29 = vector.load %arg14[%c0_10, %c0_11] : memref<16x128xf32, #tpu.memory_space<vmem>>, vector<16x128xf32>
      tpu.vector_store %arg14[%c0_10, %c0_11], %28 {strides = array<i32>} : memref<16x128xf32, #tpu.memory_space<vmem>>, vector<16x128xf32>,
    } else {
    }
    %c0_i32_3 = arith.constant 0 : i32
    %9 = arith.cmpi eq, %arg1, %c0_i32_3 : i32
    %10 = arith.extui %9 : i1 to i32
    %c0_i32_4 = arith.constant 0 : i32
    %11 = arith.cmpi ne, %10, %c0_i32_4 : i32
    scf.if %11 {
      %c0 = arith.constant 0 : index
      %c0_5 = arith.constant 0 : index
      %12 = vector.load %arg3[%c0, %c0_5] : memref<16x128xf32, #tpu.memory_space<vmem>>, vector<16x128xf32>
      %c0_6 = arith.constant 0 : index
      %c0_7 = arith.constant 0 : index
      %13 = vector.load %arg6[%c0_6, %c0_7] : memref<32x16xf32, #tpu.memory_space<vmem>>, vector<32x16xf32>
      %cst = arith.constant dense<0.000000e+00> : vector<32x128xf32>
      %14 = tpu.matmul %13, %12, %cst {dimension_numbers = #tpu.dot_dimension_numbers<[1], [0], [0], [1], [0, 0, 1, 1], [], []>} : vector<32x16xf32>, vector<16x128xf32>, vector<32x128xf32> -> vector<32x128xf32>
      %c0_8 = arith.constant 0 : index
      %c0_9 = arith.constant 0 : index
      %15 = vector.load %arg7[%c0_8, %c0_9] : memref<32x16xf32, #tpu.memory_space<vmem>>, vector<32x16xf32>
      %c0_10 = arith.constant 0 : index
      %c0_11 = arith.constant 0 : index
      %16 = vector.load %arg14[%c0_10, %c0_11] : memref<16x128xf32, #tpu.memory_space<vmem>>, vector<16x128xf32>
      %cst_12 = arith.constant dense<0.000000e+00> : vector<32x128xf32>
      %17 = tpu.matmul %15, %16, %cst_12 {dimension_numbers = #tpu.dot_dimension_numbers<[1], [0], [0], [1], [0, 0, 1, 1], [], []>} : vector<32x16xf32>, vector<16x128xf32>, vector<32x128xf32> -> vector<32x128xf32>
      %18 = arith.addf %14, %17 : vector<32x128xf32>
      %c0_13 = arith.constant 0 : index
      %c0_14 = arith.constant 0 : index
      %19 = vector.load %arg8[%c0_13, %c0_14] : memref<32x1xf32, #tpu.memory_space<vmem>>, vector<32x1xf32>
      %20 = vector.broadcast %19 : vector<32x1xf32> to vector<32x128xf32>
      %21 = arith.addf %18, %20 : vector<32x128xf32>
      %22 = arith.negf %21 : vector<32x128xf32>
      %23 = math.exp %22 : vector<32x128xf32>
      %cst_15 = arith.constant 1.000000e+00 : f32
      %24 = vector.broadcast %cst_15 : f32 to vector<32x128xf32>
      %25 = arith.addf %24, %23 : vector<32x128xf32>
      %26 = arith.divf %24, %25 : vector<32x128xf32>
      %27 = arith.mulf %21, %26 : vector<32x128xf32>
      %c0_16 = arith.constant 0 : index
      %c0_17 = arith.constant 0 : index
      %28 = vector.load %arg9[%c0_16, %c0_17] : memref<16x32xf32, #tpu.memory_space<vmem>>, vector<16x32xf32>
      %cst_18 = arith.constant dense<0.000000e+00> : vector<16x128xf32>
      %29 = tpu.matmul %28, %27, %cst_18 {dimension_numbers = #tpu.dot_dimension_numbers<[1], [0], [0], [1], [0, 0, 1, 1], [], []>} : vector<16x32xf32>, vector<32x128xf32>, vector<16x128xf32> -> vector<16x128xf32>
      %c0_19 = arith.constant 0 : index
      %c0_20 = arith.constant 0 : index
      %30 = vector.load %arg10[%c0_19, %c0_20] : memref<16x1xf32, #tpu.memory_space<vmem>>, vector<16x1xf32>
      %31 = vector.broadcast %30 : vector<16x1xf32> to vector<16x128xf32>
      %32 = arith.addf %29, %31 : vector<16x128xf32>
      %cst_21 = arith.constant dense<0.000000e+00> : vector<128xf32>
      %33 = vector.multi_reduction <add>, %32, %cst_21 [0] : vector<16x128xf32> to vector<128xf32>
      %34 = vector.shape_cast %33 : vector<128xf32> to vector<1x128xf32>
      %cst_22 = arith.constant 1.600000e+01 : f32
      %35 = vector.broadcast %cst_22 : f32 to vector<1x128xf32>
      %36 = arith.divf %34, %35 : vector<1x128xf32>
      %37 = vector.broadcast %36 : vector<1x128xf32> to vector<16x128xf32>
      %38 = arith.subf %32, %37 : vector<16x128xf32>
      %39 = arith.mulf %38, %38 : vector<16x128xf32>
      %cst_23 = arith.constant dense<0.000000e+00> : vector<128xf32>
      %40 = vector.multi_reduction <add>, %39, %cst_23 [0] : vector<16x128xf32> to vector<128xf32>
      %41 = vector.shape_cast %40 : vector<128xf32> to vector<1x128xf32>
      %cst_24 = arith.constant 1.600000e+01 : f32
      %42 = vector.broadcast %cst_24 : f32 to vector<1x128xf32>
      %43 = arith.divf %41, %42 : vector<1x128xf32>
      %44 = vector.broadcast %36 : vector<1x128xf32> to vector<16x128xf32>
      %45 = arith.subf %32, %44 : vector<16x128xf32>
      %cst_25 = arith.constant 9.99999974E-6 : f32
      %46 = vector.broadcast %cst_25 : f32 to vector<1x128xf32>
      %47 = arith.addf %43, %46 : vector<1x128xf32>
      %48 = math.rsqrt %47 : vector<1x128xf32>
      %49 = vector.broadcast %48 : vector<1x128xf32> to vector<16x128xf32>
      %50 = arith.mulf %45, %49 : vector<16x128xf32>
      %c0_26 = arith.constant 0 : index
      %c0_27 = arith.constant 0 : index
      %51 = vector.load %arg11[%c0_26, %c0_27] : memref<16x1xf32, #tpu.memory_space<vmem>>, vector<16x1xf32>
      %52 = vector.broadcast %51 : vector<16x1xf32> to vector<16x128xf32>
      %53 = arith.mulf %50, %52 : vector<16x128xf32>
      %c0_28 = arith.constant 0 : index
      %c0_29 = arith.constant 0 : index
      %54 = vector.load %arg12[%c0_28, %c0_29] : memref<16x1xf32, #tpu.memory_space<vmem>>, vector<16x1xf32>
      %55 = vector.broadcast %54 : vector<16x1xf32> to vector<16x128xf32>
      %56 = arith.addf %53, %55 : vector<16x128xf32>
      %57 = arith.addf %56, %12 : vector<16x128xf32>
      %c0_30 = arith.constant 0 : index
      %c0_31 = arith.constant 0 : index
      %58 = vector.load %arg13[%c0_30, %c0_31] : memref<16x128xf32, #tpu.memory_space<vmem>>, vector<16x128xf32>
      tpu.vector_store %arg13[%c0_30, %c0_31], %57 {strides = array<i32>} : memref<16x128xf32, #tpu.memory_space<vmem>>, vector<16x128xf32>,
    } else {
    }
    return
  }
  func.func @transform_0(%arg0: i32, %arg1: i32, %arg2: memref<1x1xi32, #tpu.memory_space<smem>>) -> (i32, i32) {
    %c0_i32 = arith.constant 0 : i32
    %c0_i32_0 = arith.constant 0 : i32
    return %c0_i32, %arg0 : i32, i32
  }
  func.func @transform_1(%arg0: i32, %arg1: i32, %arg2: memref<1x1xi32, #tpu.memory_space<smem>>) -> (i32, i32) {
    %c0_i32 = arith.constant 0 : i32
    %c0_i32_0 = arith.constant 0 : i32
    return %c0_i32, %arg1 : i32, i32
  }
  func.func @transform_2(%arg0: i32, %arg1: i32, %arg2: memref<1x1xi32, #tpu.memory_space<smem>>) -> (i32, i32) {
    %c0_i32 = arith.constant 0 : i32
    %c0_i32_0 = arith.constant 0 : i32
    return %c0_i32, %arg1 : i32, i32
  }
  func.func @transform_3(%arg0: i32, %arg1: i32, %arg2: memref<1x1xi32, #tpu.memory_space<smem>>) -> (i32, i32) {
    %c0_i32 = arith.constant 0 : i32
    %c0_i32_0 = arith.constant 0 : i32
    %c0_i32_1 = arith.constant 0 : i32
    return %c0_i32, %c0_i32_0 : i32, i32
  }
  func.func @transform_4(%arg0: i32, %arg1: i32, %arg2: memref<1x1xi32, #tpu.memory_space<smem>>) -> (i32, i32) {
    %c0_i32 = arith.constant 0 : i32
    %c0_i32_0 = arith.constant 0 : i32
    %c0_i32_1 = arith.constant 0 : i32
    return %c0_i32, %c0_i32_0 : i32, i32
  }
  func.func @transform_5(%arg0: i32, %arg1: i32, %arg2: memref<1x1xi32, #tpu.memory_space<smem>>) -> (i32, i32) {
    %c0_i32 = arith.constant 0 : i32
    %c0_i32_0 = arith.constant 0 : i32
    %c0_i32_1 = arith.constant 0 : i32
    return %c0_i32, %c0_i32_0 : i32, i32
  }
  func.func @transform_6(%arg0: i32, %arg1: i32, %arg2: memref<1x1xi32, #tpu.memory_space<smem>>) -> (i32, i32) {
    %c0_i32 = arith.constant 0 : i32
    %c0_i32_0 = arith.constant 0 : i32
    %c0_i32_1 = arith.constant 0 : i32
    return %c0_i32, %c0_i32_0 : i32, i32
  }
  func.func @transform_7(%arg0: i32, %arg1: i32, %arg2: memref<1x1xi32, #tpu.memory_space<smem>>) -> (i32, i32) {
    %c0_i32 = arith.constant 0 : i32
    %c0_i32_0 = arith.constant 0 : i32
    %c0_i32_1 = arith.constant 0 : i32
    return %c0_i32, %c0_i32_0 : i32, i32
  }
  func.func @transform_8(%arg0: i32, %arg1: i32, %arg2: memref<1x1xi32, #tpu.memory_space<smem>>) -> (i32, i32) {
    %c0_i32 = arith.constant 0 : i32
    %c0_i32_0 = arith.constant 0 : i32
    %c0_i32_1 = arith.constant 0 : i32
    return %c0_i32, %c0_i32_0 : i32, i32
  }
  func.func @transform_9(%arg0: i32, %arg1: i32, %arg2: memref<1x1xi32, #tpu.memory_space<smem>>) -> (i32, i32) {
    %c0_i32 = arith.constant 0 : i32
    %c0_i32_0 = arith.constant 0 : i32
    %c0_i32_1 = arith.constant 0 : i32
    return %c0_i32, %c0_i32_0 : i32, i32
  }
  func.func @transform_10(%arg0: i32, %arg1: i32, %arg2: memref<1x1xi32, #tpu.memory_space<smem>>) -> (i32, i32) {
    %c0_i32 = arith.constant 0 : i32
    %c0_i32_0 = arith.constant 0 : i32
    return %c0_i32, %arg0 : i32, i32
  }
}

</mosaic_0001>

<bundles_post_ra>
// kernel: tpu_custom_call.1
= control target key start
LH: loop header
LB: loop body
LE: loop exit
PB: predicated region body
PF: predicated region fallthrough
CT: control target
= control target key end

     0   :  { %17 = vsyncpa [#allocation6], 0  ;;  %v858_v0 = vmov 0.0   ;;  %s1032_s0 = inlined_call_operand.<no memory space> [shape: s32[1,1], index: 0, kind: input, shape index: {}]   ;;  %s1033_s1 = inlined_call_operand.vmem [shape: f32[16,128], index: 1, kind: input, shape index: {}]   ;;  %s1034_s2 = inlined_call_operand.vmem [shape: bf16[32,128], index: 2, kind: input, shape index: {}]   ;;  %s1035_s3 = inlined_call_operand.vmem [shape: s32[1,128], index: 3, kind: input, shape index: {}]   ;;  %s1036_s4 = inlined_call_operand.vmem [shape: f32[32,16], index: 4, kind: input, shape index: {}]   ;;  %s1037_s5 = inlined_call_operand.vmem [shape: f32[32,16], index: 5, kind: input, shape index: {}]   ;;  %s1038_s6 = inlined_call_operand.vmem [shape: f32[32,1], index: 6, kind: input, shape index: {}]   ;;  %s1039_s7 = inlined_call_operand.vmem [shape: f32[16,32], index: 7, kind: input, shape index: {}]   ;;  %s1040_s8 = inlined_call_operand.vmem [shape: f32[16,1], index: 8, kind: input, shape index: {}]   ;;  %s1041_s9 = inlined_call_operand.vmem [shape: f32[16,1], index: 9, kind: input, shape index: {}]   ;;  %s1042_s10 = inlined_call_operand.vmem [shape: f32[16,1], index: 10, kind: input, shape index: {}]   ;;  %s1043_s11 = inlined_call_operand.hbm [shape: f32[16,128], index: 11, kind: output, shape index: {}]  }
   0x1   :  { %43 = vst [vmem:[#allocation2] sm:$0xff] %v858_v0  ;;  %44 = vst [vmem:[#allocation2 + $0x8] sm:$0xff] %v858_v0  ;;  %p657_p0 = scmp.le.s32.totalorder %s1032_s0, 0 }
   0x2   :  { %v54_v1 = vlaneseq (!%p657_p0)  ;;  %v658_v2 = vld [vmem:[%s1035_s3] ss:$0 sm:$0xff] (!%p657_p0)  ;;  %v859_v8 = vmov (!%p657_p0), 1.0|1.0   ;;  %v813_v21 = vld [vmem:[%s1034_s2 + $0x8] sm:$0xff] (!%p657_p0)  }
   0x3   :  { %52 = sbr.rel (%p657_p0) target bundleno = 294 (0x126), region = 49  ;;  %v812_v3 = vld [vmem:[%s1034_s2] sm:$0xff] (!%p657_p0)  }
   0x4   :  { %v55_v4 = vshrl.u32 (!%p657_p0), %v54_v1, 7  ;;  %751 = vmatprep.mubr.bf16.mxu0 (!%p657_p0), %v812_v3 }
   0x6   :  { %v56_v5 = vadd.s32 (!%p657_p0), 8, %v55_v4  ;;  %vm93_vm0 = vcmp.eq.s32.totalorder (!%p657_p0), %v55_v4, %v658_v2  ;;  %v57_v6 = vadd.s32 (!%p657_p0), 16, %v55_v4  ;;  %v58_v7 = vadd.s32 (!%p657_p0), 24, %v55_v4 }
   0x7   :  { %v59_v9 = vadd.s32 (!%p657_p0), 32, %v55_v4  ;;  %v60_v10 = vadd.s32 (!%p657_p0), 40, %v55_v4  ;;  %v61_v11 = vadd.s32 (!%p657_p0), 48, %v55_v4  ;;  %v62_v12 = vadd.s32 (!%p657_p0), 56, %v55_v4 }
   0x8   :  { %vm94_vm1 = vcmp.eq.s32.totalorder (!%p657_p0), %v56_v5, %v658_v2  ;;  %vm95_vm2 = vcmp.eq.s32.totalorder (!%p657_p0), %v57_v6, %v658_v2  ;;  %vm96_vm3 = vcmp.eq.s32.totalorder (!%p657_p0), %v58_v7, %v658_v2  ;;  %v63_v13 = vadd.s32 (!%p657_p0), 64, %v55_v4  ;;  %v214_v24 = vld [vmem:[#allocation2] sm:$0xff] (!%p657_p0)  ;;  %v215_v28 = vld [vmem:[#allocation2 + $0x8] sm:$0xff] (!%p657_p0) }
   0x9   :  { %vm677_vm4 = vmpackc.low (!%p657_p0), %vm94_vm1, %vm93_vm0  ;;  %vm97_vm6 = vcmp.eq.s32.totalorder (!%p657_p0), %v59_v9, %v658_v2  ;;  %vm98_vm7 = vcmp.eq.s32.totalorder (!%p657_p0), %v60_v10, %v658_v2  ;;  %vm99_vm9 = vcmp.eq.s32.totalorder (!%p657_p0), %v61_v11, %v658_v2  ;;  %vm100_vm10 = vcmp.eq.s32.totalorder (!%p657_p0), %v62_v12, %v658_v2 }
   0xa   :  { %735 = vmatprep.subr.msk.bf16.mxu0 %vm677_vm4, %v859_v8  ;;  %vm679_vm5 = vmpackc.low %vm96_vm3, %vm95_vm2  ;;  %v64_v14 = vadd.s32 72, %v55_v4  ;;  %vm101_vm12 = vcmp.eq.s32.totalorder %v63_v13, %v658_v2  ;;  %v65_v15 = vadd.s32 80, %v55_v4  ;;  %v66_v16 = vadd.s32 88, %v55_v4 }
   0xb   :  { %736 = vmatpush3.bf16.xpose.msk.msra.mxu0 %vm677_vm4, %v859_v8  ;;  %vm681_vm8 = vmpackc.low %vm98_vm7, %vm97_vm6  ;;  %v67_v17 = vadd.s32 96, %v55_v4  ;;  %v68_v18 = vadd.s32 104, %v55_v4  ;;  %v69_v19 = vadd.s32 112, %v55_v4  ;;  %v70_v20 = vadd.s32 120, %v55_v4 }
   0xc   :  { %737 = vmatprep.subr.msk.bf16.mxu0 %vm679_vm5, %v859_v8  ;;  %vm683_vm11 = vmpackc.low %vm100_vm10, %vm99_vm9  ;;  %vm102_vm13 = vcmp.eq.s32.totalorder %v64_v14, %v658_v2  ;;  %vm103_vm15 = vcmp.eq.s32.totalorder %v65_v15, %v658_v2  ;;  %vm104_vm0 = vcmp.eq.s32.totalorder %v66_v16, %v658_v2 }
   0xd   :  { %vm685_vm14 = vmpackc.low %vm102_vm13, %vm101_vm12  ;;  %vm105_vm2 = vcmp.eq.s32.totalorder %v67_v17, %v658_v2  ;;  %vm106_vm3 = vcmp.eq.s32.totalorder %v68_v18, %v658_v2  ;;  %vm108_vm6 = vcmp.eq.s32.totalorder %v70_v20, %v658_v2 }
   0xe   :  { %vm687_vm1 = vmpackc.low %vm104_vm0, %vm103_vm15 }
   0xf   :  { %vm689_vm4 = vmpackc.low %vm106_vm3, %vm105_vm2 }
  0x13   :  { %738 = vmatpush3.bf16.xpose.msk.msra.mxu0 %vm679_vm5, %v859_v8  ;;  %vm107_vm5 = vcmp.eq.s32.totalorder %v69_v19, %v658_v2 }
  0x14   :  { %739 = vmatprep.subr.msk.bf16.mxu0 %vm681_vm8, %v859_v8  ;;  %vm691_vm7 = vmpackc.low %vm108_vm6, %vm107_vm5 }
  0x1b   :  { %740 = vmatpush3.bf16.xpose.msk.msra.mxu0 %vm681_vm8, %v859_v8 }
  0x1c   :  { %741 = vmatprep.subr.msk.bf16.mxu0 %vm683_vm11, %v859_v8 }
  0x23   :  { %742 = vmatpush3.bf16.xpose.msk.msra.mxu0 %vm683_vm11, %v859_v8 }
  0x24   :  { %743 = vmatprep.subr.msk.bf16.mxu0 %vm685_vm14, %v859_v8 }
  0x2b   :  { %744 = vmatpush3.bf16.xpose.msk.msra.mxu0 %vm685_vm14, %v859_v8 }
  0x2c   :  { %745 = vmatprep.subr.msk.bf16.mxu0 %vm687_vm1, %v859_v8 }
  0x33   :  { %746 = vmatpush3.bf16.xpose.msk.msra.mxu0 %vm687_vm1, %v859_v8 }
  0x34   :  { %747 = vmatprep.subr.msk.bf16.mxu0 %vm689_vm4, %v859_v8 }
  0x3b   :  { %748 = vmatpush3.bf16.xpose.msk.msra.mxu0 %vm689_vm4, %v859_v8 }
  0x3c   :  { %749 = vmatprep.subr.msk.bf16.mxu0 %vm691_vm7, %v859_v8 }
  0x43   :  { %750 = vmatpush3.bf16.xpose.msk.msra.mxu0 %vm691_vm7, %v859_v8 }
  0x4a   :  { %752 = vmatmul.mubr.bf16.vlgmr.msra.gmra.mrb[0].mxu0 %v813_v21 }
 0x11d   :  { %v753_v22 = vpop.f32.mrb[0].mxu0 }
 0x11e   :  { %v199_v23 = vpop.f32.mrb[1].mxu0 }
 0x11f   :  { %v216_v25 = vadd.f32 %v753_v22, %v199_v23  ;;  %v754_v26 = vpop.f32.mrb[2].mxu0 }
 0x120   :  { %v202_v27 = vpop.f32.mrb[3].mxu0 }
 0x121   :  { %v218_v29 = vadd.f32 %v216_v25, %v214_v24  ;;  %v217_v30 = vadd.f32 %v754_v26, %v202_v27 }
 0x123   :  { %220 = vst [vmem:[#allocation2] sm:$0xff] %v218_v29  ;;  %v219_v31 = vadd.f32 %v217_v30, %v215_v28 }
 0x125   :  { %221 = vst [vmem:[#allocation2 + $0x8] sm:$0xff] %v219_v31 }
 0x126 PF:  { %v939_v34 = vld [vmem:[%s1033_s1] sm:$0xff]  ;;  %vm237_vm8 = vcmask 130048   ;;  %v944_v36 = vld [vmem:[%s1033_s1 + $0x8] sm:$0xff]  ;;  %v860_v39 = vmov 0   ;;  %v434_v43 = vld [vmem:[%s1038_s6 + $0x10] sm:$0xff]  ;;  %vm502_vm9 = vcmask 261120  }
 0x127   :  { %v231_v37 = vld [vmem:[%s1037_s5] sm:$0xff]  ;;  %814 = vset.pattern.permute.xlu0 %v860_v39  ;;  %815 = vset.pattern.permute.xlu1 %v860_v39  ;;  %v790_v40 = vpack.c.bf16 %v944_v36, %v939_v34  ;;  %v232_v41 = vld [vmem:[%s1037_s5 + $0x8] sm:$0xff]  ;;  %v233_v45 = vld [vmem:[%s1037_s5 + $0x10] sm:$0xff] }
 0x128   :  { %v227_v38 = vld [vmem:[%s1036_s4] sm:$0xff]  ;;  %759 = vmatprep.mubr.msk.f32.mxu1 %vm237_vm8, %v231_v37  ;;  %v228_v44 = vld [vmem:[%s1036_s4 + $0x8] sm:$0xff]  ;;  %v229_v46 = vld [vmem:[%s1036_s4 + $0x10] sm:$0xff]  ;;  %448 = vperm.xlu1 %815, %v434_v43  }
 0x129   :  { %769 = vmatprep.mubr.msk.f32.mxu0 %vm237_vm8, %v227_v38  ;;  %791 = vmatprep.subr.bf16.mxu0 %v790_v40  ;;  %v432_v42 = vld [vmem:[%s1038_s6] sm:$0xff]  ;;  %v433_v47 = vld [vmem:[%s1038_s6 + $0x8] sm:$0xff]  ;;  %v435_v48 = vld [vmem:[%s1038_s6 + $0x18] sm:$0xff] }
 0x12a   :  { %v235_v32 = vld [vmem:[#allocation2] sm:$0xff]  ;;  %793 = vmatpush3.bf16.msra.mxu0 %v790_v40  ;;  %438 = vperm.xlu0 %814, %v432_v42   ;;  %v234_v49 = vld [vmem:[%s1037_s5 + $0x18] sm:$0xff]  ;;  %v491_v52 = vld [vmem:[%s1040_s8 + $0x8] sm:$0xff] }
 0x12b   :  { %v230_v50 = vld [vmem:[%s1036_s4 + $0x18] sm:$0xff]  ;;  %v490_v51 = vld [vmem:[%s1040_s8] sm:$0xff]  ;;  %v610_v54 = vld [vmem:[%s1041_s9 + $0x8] sm:$0xff] }
 0x12c   :  { %v236_v33 = vld [vmem:[#allocation2 + $0x8] sm:$0xff]  ;;  %453 = vperm.xlu1 %815, %v435_v48   ;;  %v609_v53 = vld [vmem:[%s1041_s9] sm:$0xff] }
 0x12d   :  { %v786_v35 = vpack.c.bf16 %v236_v33, %v235_v32  ;;  %770 = vmatmul.mubr.msk.f32.vlgmr.msra.gmra.mrb[0].mxu0 %vm237_vm8, %v228_v44  ;;  %v623_v55 = vld [vmem:[%s1042_s10] sm:$0xff]  ;;  %v624_v56 = vld [vmem:[%s1042_s10 + $0x8] sm:$0xff] }
 0x12e   :  { %772 = vmatprep.mubr.msk.f32.mxu0 %vm237_vm8, %v229_v46  ;;  %443 = vperm.xlu0 %814, %v433_v47   ;;  %v488_v57 = vld [vmem:[%s1039_s7] sm:$0xff]  ;;  %v489_v38 = vld [vmem:[%s1039_s7 + $0x8] sm:$0xff]  ;;  %s861_s7 = smov [#allocation5]  }
 0x12f   :  { %787 = vmatprep.subr.bf16.mxu1 %v786_v35  ;;  %s646_s17 = sshll.u32 %s861_s7, 4  ;;  %s647_s17 = int_to_ptr.vmem [resolvable:$true] %s646_s17 }
 0x130   :  { %789 = vmatpush3.bf16.msra.mxu1 %v786_v35  ;;  %499 = vperm.xlu1 %815, %v491_v52   ;;  %s834_s18 = scalar_lea.vmem %s647_s17, 256  ;;  %p839_p2 = scmp.lt.s32.totalorder %s647_s17, %s647_s17 }
 0x131   :  { %773 = vmatmul.mubr.msk.f32.gmra.mrb[2].mxu0 %vm237_vm8, %v230_v50  ;;  %p835_p1 = scmp.ne.s32.totalorder %s647_s17, %s834_s18  ;;  %p840_p3 = scmp.lt.s32.totalorder %s834_s18, %s834_s18 }
 0x132   :  { %494 = vperm.xlu0 %814, %v490_v51  }
 0x133   :  { %760 = vmatmul.mubr.msk.f32.vlgmr.msra.gmra.mrb[0].mxu1 %vm237_vm8, %v232_v41  ;;  %p841_p4 = por %p840_p3, %p839_p2 }
 0x134   :  { %762 = vmatprep.mubr.msk.f32.mxu1 %vm237_vm8, %v233_v45  ;;  %618 = vperm.xlu1 %815, %v610_v54  }
 0x135   :  { %p842_p5 = pnand %p841_p4, %p835_p1 }
 0x136   :  { %613 = vperm.xlu0 %814, %v609_v53  }
 0x137   :  { %763 = vmatmul.mubr.msk.f32.gmra.mrb[2].mxu1 %vm237_vm8, %v234_v49 }
 0x138   :  { %632 = vperm.xlu1 %815, %v624_v56   ;;  %783 = vmatprep.mubr.msk.f32.mxu1 %vm502_vm9, %v488_v57 }
 0x13a   :  { %627 = vperm.xlu0 %814, %v623_v55  }
 0x1a7   :  { %v449_v59 = vpop.permute.xlu1 %448 }
 0x1a9   :  { %v439_v58 = vpop.permute.xlu0 %438 }
 0x1ab   :  { %v454_v11 = vpop.permute.xlu1 %453 }
 0x1ad   :  { %v444_v1 = vpop.permute.xlu0 %443 }
 0x1af   :  { %v500_v39 = vpop.permute.xlu1 %499 }
 0x1b1   :  { %v495_v41 = vpop.permute.xlu0 %494 }
 0x200   :  { %v771_v61 = vpop.f32.mrb[0].mxu0 }
 0x201   :  { %v413_v0 = vpop.f32.mrb[1].mxu0 }
 0x204   :  { %v774_v6 = vpop.f32.mrb[2].mxu0 }
 0x205   :  { %v423_v10 = vpop.f32.mrb[3].mxu0 }
 0x206   :  { %v761_v60 = vpop.f32.mrb[0].mxu1 }
 0x207   :  { %v316_v62 = vpop.f32.mrb[1].mxu1  ;;  %v419_v63 = vadd.f32 %v771_v61, %v761_v60 }
 0x208   :  { %v414_v2 = vadd.f32 %v413_v0, %v316_v62 }
 0x209   :  { %v457_v3 = vadd.f32 %v444_v1, %v419_v63 }
 0x20a   :  { %v764_v4 = vpop.f32.mrb[2].mxu1  ;;  %v456_v5 = vadd.f32 %v439_v58, %v414_v2  ;;  %v614_v2 = vpop.permute.xlu0 %613 }
 0x20b   :  { %v326_v7 = vpop.f32.mrb[3].mxu1  ;;  %v702_v8 = vmul.f32 -1.442695, %v457_v3  ;;  %v429_v9 = vadd.f32 %v774_v6, %v764_v4 }
 0x20c   :  { %v701_v12 = vmul.f32 -1.442695, %v456_v5  ;;  %v424_v13 = vadd.f32 %v423_v10, %v326_v7 }
 0x20d   :  { %816 = vpow2.f32 %v702_v8  ;;  %v459_v14 = vadd.f32 %v454_v11, %v429_v9 }
 0x20e   :  { %818 = vpow2.f32 %v701_v12  ;;  %v458_v15 = vadd.f32 %v449_v59, %v424_v13  ;;  %v628_v9 = vpop.permute.xlu0 %627 }
 0x20f   :  { %v704_v16 = vmul.f32 -1.442695, %v459_v14 }
 0x210   :  { %v703_v17 = vmul.f32 -1.442695, %v458_v15 }
 0x211   :  { %820 = vpow2.f32 %v704_v16 }
 0x212   :  { %822 = vpow2.f32 %v703_v17 }
 0x217   :  { %v817_v18 = vpop.eup %816 }
 0x218   :  { %v819_v19 = vpop.eup %818  ;;  %v473_v20 = vadd.f32 1.0, %v817_v18 }
 0x219   :  { %v472_v21 = vadd.f32 1.0, %v819_v19 }
 0x21a   :  { %824 = vrcp.f32 %v473_v20 }
 0x21b   :  { %v821_v22 = vpop.eup %820  ;;  %826 = vrcp.f32 %v472_v21 }
 0x21c   :  { %v823_v23 = vpop.eup %822  ;;  %v475_v24 = vadd.f32 1.0, %v821_v22 }
 0x21d   :  { %v474_v25 = vadd.f32 1.0, %v823_v23 }
 0x21e   :  { %828 = vrcp.f32 %v475_v24 }
 0x21f   :  { %830 = vrcp.f32 %v474_v25 }
 0x224   :  { %v825_v26 = vpop.eup %824 }
 0x225   :  { %v827_v27 = vpop.eup %826  ;;  %v485_v28 = vmul.f32 %v825_v26, %v457_v3  ;;  %v619_v3 = vpop.permute.xlu1 %618 }
 0x226   :  { %v484_v29 = vmul.f32 %v827_v27, %v456_v5 }
 0x228   :  { %v829_v30 = vpop.eup %828  ;;  %v794_v31 = vpack.c.bf16 %v485_v28, %v484_v29 }
 0x229   :  { %v831_v32 = vpop.eup %830  ;;  %v487_v33 = vmul.f32 %v829_v30, %v459_v14  ;;  %v633_v10 = vpop.permute.xlu1 %632 }
 0x22a   :  { %v486_v35 = vmul.f32 %v831_v32, %v458_v15  ;;  %795 = vmatprep.subr.bf16.mxu1 %v794_v31 }
 0x22b   :  { %797 = vmatpush3.bf16.msra.mxu1 %v794_v31 }
 0x22c   :  { %v798_v37 = vpack.c.bf16 %v487_v33, %v486_v35 }
 0x22e   :  { %799 = vmatprep.subr.bf16.mxu1 %v798_v37 }
 0x22f   :  { %801 = vmatpush3.bf16.msra.mxu1 %v798_v37 }
 0x232   :  { %784 = vmatmul.mubr.msk.f32.vlgmr.msra.gmra.mrb[4].mxu1 %vm502_vm9, %v489_v38 }
 0x305   :  { %v785_v40 = vpop.f32.mrb[4].mxu1 }
 0x306   :  { %v581_v42 = vadd.f32 %v785_v40, %v500_v39  ;;  %v575_v43 = vpop.f32.mrb[5].mxu1 }
 0x307   :  { %v576_v44 = vadd.f32 %v575_v43, %v495_v41 }
 0x309   :  { %v584_v45 = vadd.f32 %v581_v42, %v576_v44 }
 0x30b   :  { %v585_v46 = vrot.slane %v584_v45, 4 }
 0x30d   :  { %v586_v47 = vadd.f32 %v585_v46, %v584_v45 }
 0x30f   :  { %v587_v48 = vrot.slane %v586_v47, 2 }
 0x311   :  { %v588_v49 = vadd.f32 %v587_v48, %v586_v47 }
 0x313   :  { %v589_v50 = vrot.slane %v588_v49, 1 }
 0x315   :  { %v590_v51 = vadd.f32 %v589_v50, %v588_v49 }
 0x317   :  { %v592_v52 = vmul.f32 0.0625, %v590_v51 }
 0x319   :  { %v593_v53 = vsub.f32 %v576_v44, %v592_v52  ;;  %v594_v54 = vsub.f32 %v581_v42, %v592_v52 }
 0x31b   :  { %v595_v55 = vmul.f32 %v593_v53, %v593_v53  ;;  %v596_v56 = vmul.f32 %v594_v54, %v594_v54 }
 0x31d   :  { %v597_v57 = vadd.f32 %v596_v56, %v595_v55 }
 0x31f   :  { %v598_v58 = vrot.slane %v597_v57, 4 }
 0x321   :  { %v599_v59 = vadd.f32 %v598_v58, %v597_v57 }
 0x323   :  { %v600_v60 = vrot.slane %v599_v59, 2 }
 0x325   :  { %v601_v61 = vadd.f32 %v600_v60, %v599_v59 }
 0x327   :  { %v602_v62 = vrot.slane %v601_v61, 1 }
 0x329   :  { %v603_v63 = vadd.f32 %v602_v62, %v601_v61 }
 0x32b   :  { %v604_v0 = vmul.f32 0.0625, %v603_v63 }
 0x32d   :  { %v605_v1 = vadd.f32 1e-05, %v604_v0 }
 0x32f   :  { %832 = vrsqrt.f32 %v605_v1 }
 0x339   :  { %v833_v4 = vpop.eup %832 }
 0x33a   :  { %v607_v5 = vmul.f32 %v833_v4, %v593_v53  ;;  %v608_v6 = vmul.f32 %v833_v4, %v594_v54 }
 0x33c   :  { %v621_v7 = vmul.f32 %v614_v2, %v607_v5  ;;  %v622_v8 = vmul.f32 %v619_v3, %v608_v6 }
 0x33e   :  { %v635_v11 = vadd.f32 %v628_v9, %v621_v7  ;;  %v636_v12 = vadd.f32 %v633_v10, %v622_v8 }
 0x340   :  { %v637_v13 = vadd.f32 %v635_v11, %v939_v34  ;;  %v638_v14 = vadd.f32 %v636_v12, %v944_v36 }
 0x342   :  { %639 = vst [vmem:[#allocation5] sm:$0xff] %v637_v13  ;;  %640 = vst [vmem:[#allocation5 + $0x8] sm:$0xff] %v638_v14 }
 0x343   :  { %845 = shalt.err (!%p842_p5)
}
 0x344   :  { %s846_s21 = scalar_lea.hbm %s1043_s11, 256 }
 0x345   :  { %p847_p6 = scmp.ne.s32.totalorder %s1043_s11, %s846_s21  ;;  %p850_p7 = scmp.lt.u32.totalorder %s846_s21, %s1043_s11 }
 0x347   :  { %p852_p8 = pnand %p850_p7, %p847_p6 }
 0x349   :  { %855 = shalt.err (!%p852_p8)
}
 0x34a   :  { %s862_s24 = smov 128   ;;  %s863_s2 = smov 8  }
 0x34b   :  { %652 = dma.vmem_to_hbm [thread:$0]  %s647_s17, 256, %s1043_s11, [#allocation6], %s862_s24, %s862_s24, %s863_s2  }
 0x34c   :  { %856 = dma.done.wait [#allocation6], 256  }
 0x34d   :  { %857 = vsyncadd [#allocation6], 4294967040 }
 0x34e   :  { %656 = vsyncpa [#allocation6], 1 }

</bundles_post_ra>
